<compile_context>
chip_gen: v6e
topology: v6e:2x2x1
jax: 0.10.0
libtpu: 0.0.40
codegen_flags: <defaults>
</compile_context>

<pallas_src>
import functools

import jax
import jax.numpy as jnp
from jax.experimental import pallas as pl
from jax.experimental.pallas import tpu as pltpu

LANES = 128
SUBLANES = 8
MAX_BLOCK_ROWS = 1024  # 1024 x 128 f32 = 512 KiB per input block


def _round_up(n, m):
    return ((n + m - 1) // m) * m


def _dice_loss_kernel(x_ref, t_ref, o_ref, inter_ref, psum_ref, tsum_ref,
                      *, log, block_rows):
    step = pl.program_id(0)

    @pl.when(step == 0)
    def _():
        inter_ref[...] = jnp.zeros_like(inter_ref)
        psum_ref[...] = jnp.zeros_like(psum_ref)
        tsum_ref[...] = jnp.zeros_like(tsum_ref)

    p = jax.nn.sigmoid(x_ref[...].astype(jnp.float32))
    t = t_ref[...].astype(jnp.float32)

    # Vreg-shaped partial accumulation: reduce only the leading row-group axis
    # (pure VPU adds); the cross-lane/sublane XLU reduce happens once in the
    # last-step epilogue.
    g = block_rows // SUBLANES
    inter_ref[...] += jnp.sum((p * t).reshape(g, SUBLANES, LANES), axis=0)
    psum_ref[...] += jnp.sum(p.reshape(g, SUBLANES, LANES), axis=0)
    tsum_ref[...] += jnp.sum(t.reshape(g, SUBLANES, LANES), axis=0)

    @pl.when(step == pl.num_programs(0) - 1)
    def _():
        smooth = jnp.float32(1.0)
        inter = jnp.sum(inter_ref[...], keepdims=True)  # (1, 1)
        psum = jnp.sum(psum_ref[...], keepdims=True)
        tsum = jnp.sum(tsum_ref[...], keepdims=True)
        dice = (2.0 * inter + smooth) / (psum + tsum + smooth)
        if log:
            o_ref[...] = -jnp.log(dice)
        else:
            o_ref[...] = 1.0 - dice


def dice_loss(x, target, *, log=False):
    """Pallas implementation of DiceLoss.forward (threshold=None, as in the module)."""
    total = x.size
    assert total == target.size, "input and target must have same number of elems"
    assert jnp.issubdtype(x.dtype, jnp.floating), "input logits must be floating"

    # Flatten row-major (same ordering as torch .view(-1)); keep native dtypes,
    # the kernel upcasts to f32 internally.
    xf = jnp.ravel(x)
    tf = jnp.ravel(target)

    # Choose the row block: as close to MAX_BLOCK_ROWS as possible while
    # minimizing padding.  Rounded to a multiple of 16 (legal sublane tiling
    # for both f32 and packed bf16).
    rows_raw = -(-total // LANES)
    n_blocks = max(1, -(-rows_raw // MAX_BLOCK_ROWS))
    block_rows = _round_up(-(-rows_raw // n_blocks), 2 * SUBLANES)
    rows = n_blocks * block_rows
    padded_total = rows * LANES

    pad = padded_total - total
    if pad:
        # Padded logits -> -1e30 so sigmoid() is exactly 0 (contributes nothing
        # to psum / intersection); padded targets -> 0.
        xf = jnp.pad(xf, (0, pad), constant_values=-1e30)
        tf = jnp.pad(tf, (0, pad), constant_values=0)

    x2 = xf.reshape(rows, LANES)
    t2 = tf.reshape(rows, LANES)

    out = pl.pallas_call(
        functools.partial(_dice_loss_kernel, log=log, block_rows=block_rows),
        out_shape=jax.ShapeDtypeStruct((1, 1), jnp.float32),
        grid_spec=pltpu.PrefetchScalarGridSpec(
            num_scalar_prefetch=0,
            grid=(n_blocks,),
            in_specs=[
                pl.BlockSpec((block_rows, LANES), lambda i: (i, 0)),
                pl.BlockSpec((block_rows, LANES), lambda i: (i, 0)),
            ],
            out_specs=pl.BlockSpec((1, 1), lambda i: (0, 0)),
            scratch_shapes=[
                pltpu.VMEM((SUBLANES, LANES), jnp.float32),  # intersection partials
                pltpu.VMEM((SUBLANES, LANES), jnp.float32),  # sum(sigmoid(x)) partials
                pltpu.VMEM((SUBLANES, LANES), jnp.float32),  # sum(target) partials
            ],
        ),
        compiler_params=pltpu.CompilerParams(
            dimension_semantics=("arbitrary",),  # grid axis is the reduction
        ),
    )(x2, t2)
    return out.reshape(())  # scalar, matching the PyTorch scalar loss


def _dice_loss_ref(x, target, *, log=False):
    """Pure-JAX reference for correctness checking."""
    p = jax.nn.sigmoid(x.astype(jnp.float32)).reshape(-1)
    t = target.astype(jnp.float32).reshape(-1)
    smooth = 1.0
    dice = (2.0 * jnp.sum(p * t) + smooth) / (jnp.sum(p) + jnp.sum(t) + smooth)
    return -jnp.log(dice) if log else 1.0 - dice


if __name__ == "__main__":
    key = jax.random.PRNGKey(0)
    k1, k2, k3, k4 = jax.random.split(key, 4)

    # Small NCHW segmentation-style input, as the module expects.
    B, C, H, W = 2, 4, 16, 16
    x = jax.random.normal(k1, (B, C, H, W), dtype=jnp.float32)
    target = (jax.random.uniform(k2, (B, C, H, W)) > 0.5).astype(jnp.float32)

    for log in (False, True):
        loss = dice_loss(x, target, log=log)
        jax.block_until_ready(loss)
        ref = _dice_loss_ref(x, target, log=log)
        assert jnp.allclose(loss, ref, atol=1e-5, rtol=1e-5), (log, loss, ref)

    # Non-1024-aligned, multi-grid-step shape: exercises padding + the
    # multi-block accumulation path.
    B2, C2, H2, W2 = 2, 8, 96, 97
    xb = jax.random.normal(k3, (B2, C2, H2, W2), dtype=jnp.float32)
    tb = (jax.random.uniform(k4, (B2, C2, H2, W2)) > 0.5).astype(jnp.float32)
    loss_b = dice_loss(xb, tb, log=False)
    jax.block_until_ready(loss_b)
    ref_b = _dice_loss_ref(xb, tb, log=False)
    assert jnp.allclose(loss_b, ref_b, atol=1e-5, rtol=1e-5), (loss_b, ref_b)

    print("KERNEL_OK")
</pallas_src>

<mosaic_0001>
module attributes {stable_mosaic.version = 11 : i64} {
  func.func @_dice_loss_kernel(%arg0: i32, %arg1: memref<16x128xf32, #tpu.memory_space<vmem>>, %arg2: memref<16x128xf32, #tpu.memory_space<vmem>>, %arg3: memref<1x1xf32, #tpu.memory_space<vmem>>, %arg4: memref<8x128xf32, #tpu.memory_space<vmem>>, %arg5: memref<8x128xf32, #tpu.memory_space<vmem>>, %arg6: memref<8x128xf32, #tpu.memory_space<vmem>>) attributes {dimension_semantics = [#tpu.dimension_semantics<arbitrary>], iteration_bounds = array<i64: 1>, scalar_prefetch = 0 : i64, scratch_operands = 3 : i64, tpu.core_type = #tpu.core_type<tc>, window_params = [{transform_indices = @transform_0, window_bounds = array<i64: 16, 128>}, {transform_indices = @transform_1, window_bounds = array<i64: 16, 128>}, {pipeline_mode = #tpu.pipeline_mode<synchronous>, transform_indices = @transform_2, window_bounds = array<i64: 1, 1>}]} {
    %c0_i32 = arith.constant 0 : i32
    %0 = arith.cmpi eq, %arg0, %c0_i32 : i32
    %1 = arith.extui %0 : i1 to i32
    %c0_i32_0 = arith.constant 0 : i32
    %2 = arith.cmpi ne, %1, %c0_i32_0 : i32
    scf.if %2 {
      %cst_21 = arith.constant 0.000000e+00 : f32
      %29 = vector.broadcast %cst_21 : f32 to vector<8x128xf32>
      %c0_22 = arith.constant 0 : index
      %c0_23 = arith.constant 0 : index
      %30 = vector.load %arg4[%c0_22, %c0_23] : memref<8x128xf32, #tpu.memory_space<vmem>>, vector<8x128xf32>
      tpu.vector_store %arg4[%c0_22, %c0_23], %29 {strides = array<i32>} : memref<8x128xf32, #tpu.memory_space<vmem>>, vector<8x128xf32>,
      %cst_24 = arith.constant 0.000000e+00 : f32
      %31 = vector.broadcast %cst_24 : f32 to vector<8x128xf32>
      %c0_25 = arith.constant 0 : index
      %c0_26 = arith.constant 0 : index
      %32 = vector.load %arg5[%c0_25, %c0_26] : memref<8x128xf32, #tpu.memory_space<vmem>>, vector<8x128xf32>
      tpu.vector_store %arg5[%c0_25, %c0_26], %31 {strides = array<i32>} : memref<8x128xf32, #tpu.memory_space<vmem>>, vector<8x128xf32>,
      %cst_27 = arith.constant 0.000000e+00 : f32
      %33 = vector.broadcast %cst_27 : f32 to vector<8x128xf32>
      %c0_28 = arith.constant 0 : index
      %c0_29 = arith.constant 0 : index
      %34 = vector.load %arg6[%c0_28, %c0_29] : memref<8x128xf32, #tpu.memory_space<vmem>>, vector<8x128xf32>
      tpu.vector_store %arg6[%c0_28, %c0_29], %33 {strides = array<i32>} : memref<8x128xf32, #tpu.memory_space<vmem>>, vector<8x128xf32>,
    } else {
    }
    %c0 = arith.constant 0 : index
    %c0_1 = arith.constant 0 : index
    %3 = vector.load %arg1[%c0, %c0_1] : memref<16x128xf32, #tpu.memory_space<vmem>>, vector<16x128xf32>
    %4 = arith.negf %3 : vector<16x128xf32>
    %5 = math.exp %4 : vector<16x128xf32>
    %cst = arith.constant 1.000000e+00 : f32
    %6 = vector.broadcast %cst : f32 to vector<16x128xf32>
    %7 = arith.addf %6, %5 : vector<16x128xf32>
    %8 = arith.divf %6, %7 : vector<16x128xf32>
    %c0_2 = arith.constant 0 : index
    %c0_3 = arith.constant 0 : index
    %9 = vector.load %arg2[%c0_2, %c0_3] : memref<16x128xf32, #tpu.memory_space<vmem>>, vector<16x128xf32>
    %c0_4 = arith.constant 0 : index
    %c0_5 = arith.constant 0 : index
    %10 = vector.load %arg4[%c0_4, %c0_5] : memref<8x128xf32, #tpu.memory_space<vmem>>, vector<8x128xf32>
    %11 = arith.mulf %8, %9 : vector<16x128xf32>
    %12 = vector.shape_cast %11 : vector<16x128xf32> to vector<2x8x128xf32>
    %cst_6 = arith.constant dense<0.000000e+00> : vector<8x128xf32>
    %13 = vector.multi_reduction <add>, %12, %cst_6 [0] : vector<2x8x128xf32> to vector<8x128xf32>
    %14 = arith.addf %10, %13 : vector<8x128xf32>
    %c0_7 = arith.constant 0 : index
    %c0_8 = arith.constant 0 : index
    %15 = vector.load %arg4[%c0_7, %c0_8] : memref<8x128xf32, #tpu.memory_space<vmem>>, vector<8x128xf32>
    tpu.vector_store %arg4[%c0_7, %c0_8], %14 {strides = array<i32>} : memref<8x128xf32, #tpu.memory_space<vmem>>, vector<8x128xf32>,
    %c0_9 = arith.constant 0 : index
    %c0_10 = arith.constant 0 : index
    %16 = vector.load %arg5[%c0_9, %c0_10] : memref<8x128xf32, #tpu.memory_space<vmem>>, vector<8x128xf32>
    %17 = vector.shape_cast %8 : vector<16x128xf32> to vector<2x8x128xf32>
    %cst_11 = arith.constant dense<0.000000e+00> : vector<8x128xf32>
    %18 = vector.multi_reduction <add>, %17, %cst_11 [0] : vector<2x8x128xf32> to vector<8x128xf32>
    %19 = arith.addf %16, %18 : vector<8x128xf32>
    %c0_12 = arith.constant 0 : index
    %c0_13 = arith.constant 0 : index
    %20 = vector.load %arg5[%c0_12, %c0_13] : memref<8x128xf32, #tpu.memory_space<vmem>>, vector<8x128xf32>
    tpu.vector_store %arg5[%c0_12, %c0_13], %19 {strides = array<i32>} : memref<8x128xf32, #tpu.memory_space<vmem>>, vector<8x128xf32>,
    %c0_14 = arith.constant 0 : index
    %c0_15 = arith.constant 0 : index
    %21 = vector.load %arg6[%c0_14, %c0_15] : memref<8x128xf32, #tpu.memory_space<vmem>>, vector<8x128xf32>
    %22 = vector.shape_cast %9 : vector<16x128xf32> to vector<2x8x128xf32>
    %cst_16 = arith.constant dense<0.000000e+00> : vector<8x128xf32>
    %23 = vector.multi_reduction <add>, %22, %cst_16 [0] : vector<2x8x128xf32> to vector<8x128xf32>
    %24 = arith.addf %21, %23 : vector<8x128xf32>
    %c0_17 = arith.constant 0 : index
    %c0_18 = arith.constant 0 : index
    %25 = vector.load %arg6[%c0_17, %c0_18] : memref<8x128xf32, #tpu.memory_space<vmem>>, vector<8x128xf32>
    tpu.vector_store %arg6[%c0_17, %c0_18], %24 {strides = array<i32>} : memref<8x128xf32, #tpu.memory_space<vmem>>, vector<8x128xf32>,
    %c0_i32_19 = arith.constant 0 : i32
    %26 = arith.cmpi eq, %arg0, %c0_i32_19 : i32
    %27 = arith.extui %26 : i1 to i32
    %c0_i32_20 = arith.constant 0 : i32
    %28 = arith.cmpi ne, %27, %c0_i32_20 : i32
    scf.if %28 {
      %c0_21 = arith.constant 0 : index
      %c0_22 = arith.constant 0 : index
      %29 = vector.load %arg4[%c0_21, %c0_22] : memref<8x128xf32, #tpu.memory_space<vmem>>, vector<8x128xf32>
      %30 = vector.shape_cast %29 : vector<8x128xf32> to vector<1x8x128xf32>
      %cst_23 = arith.constant dense<0.000000e+00> : vector<1xf32>
      %31 = vector.multi_reduction <add>, %30, %cst_23 [1, 2] : vector<1x8x128xf32> to vector<1xf32>
      %32 = vector.shape_cast %31 : vector<1xf32> to vector<1x1x1xf32>
      %33 = vector.extract %32[0, 0, 0] : f32 from vector<1x1x1xf32>
      %34 = vector.broadcast %33 : f32 to vector<1x1xf32>
      %c0_24 = arith.constant 0 : index
      %c0_25 = arith.constant 0 : index
      %35 = vector.load %arg5[%c0_24, %c0_25] : memref<8x128xf32, #tpu.memory_space<vmem>>, vector<8x128xf32>
      %36 = vector.shape_cast %35 : vector<8x128xf32> to vector<1x8x128xf32>
      %cst_26 = arith.constant dense<0.000000e+00> : vector<1xf32>
      %37 = vector.multi_reduction <add>, %36, %cst_26 [1, 2] : vector<1x8x128xf32> to vector<1xf32>
      %38 = vector.shape_cast %37 : vector<1xf32> to vector<1x1x1xf32>
      %39 = vector.extract %38[0, 0, 0] : f32 from vector<1x1x1xf32>
      %40 = vector.broadcast %39 : f32 to vector<1x1xf32>
      %c0_27 = arith.constant 0 : index
      %c0_28 = arith.constant 0 : index
      %41 = vector.load %arg6[%c0_27, %c0_28] : memref<8x128xf32, #tpu.memory_space<vmem>>, vector<8x128xf32>
      %42 = vector.shape_cast %41 : vector<8x128xf32> to vector<1x8x128xf32>
      %cst_29 = arith.constant dense<0.000000e+00> : vector<1xf32>
      %43 = vector.multi_reduction <add>, %42, %cst_29 [1, 2] : vector<1x8x128xf32> to vector<1xf32>
      %44 = vector.shape_cast %43 : vector<1xf32> to vector<1x1x1xf32>
      %45 = vector.extract %44[0, 0, 0] : f32 from vector<1x1x1xf32>
      %46 = vector.broadcast %45 : f32 to vector<1x1xf32>
      %cst_30 = arith.constant 2.000000e+00 : f32
      %47 = vector.broadcast %cst_30 : f32 to vector<1x1xf32>
      %48 = arith.mulf %47, %34 : vector<1x1xf32>
      %cst_31 = arith.constant 1.000000e+00 : f32
      %49 = vector.broadcast %cst_31 : f32 to vector<1x1xf32>
      %50 = arith.addf %48, %49 : vector<1x1xf32>
      %51 = arith.addf %40, %46 : vector<1x1xf32>
      %cst_32 = arith.constant 1.000000e+00 : f32
      %52 = vector.broadcast %cst_32 : f32 to vector<1x1xf32>
      %53 = arith.addf %51, %52 : vector<1x1xf32>
      %54 = arith.divf %50, %53 : vector<1x1xf32>
      %cst_33 = arith.constant 1.000000e+00 : f32
      %55 = vector.broadcast %cst_33 : f32 to vector<1x1xf32>
      %56 = arith.subf %55, %54 : vector<1x1xf32>
      %c0_34 = arith.constant 0 : index
      %c0_35 = arith.constant 0 : index
      %57 = vector.load %arg3[%c0_34, %c0_35] : memref<1x1xf32, #tpu.memory_space<vmem>>, vector<1x1xf32>
      tpu.vector_store %arg3[%c0_34, %c0_35], %56 {strides = array<i32>} : memref<1x1xf32, #tpu.memory_space<vmem>>, vector<1x1xf32>,
    } else {
    }
    return
  }
  func.func @transform_0(%arg0: i32) -> (i32, i32) {
    %c0_i32 = arith.constant 0 : i32
    %c0_i32_0 = arith.constant 0 : i32
    return %arg0, %c0_i32 : i32, i32
  }
  func.func @transform_1(%arg0: i32) -> (i32, i32) {
    %c0_i32 = arith.constant 0 : i32
    %c0_i32_0 = arith.constant 0 : i32
    return %arg0, %c0_i32 : i32, i32
  }
  func.func @transform_2(%arg0: i32) -> (i32, i32) {
    %c0_i32 = arith.constant 0 : i32
    %c0_i32_0 = arith.constant 0 : i32
    %c0_i32_1 = arith.constant 0 : i32
    return %c0_i32, %c0_i32_0 : i32, i32
  }
}

</mosaic_0001>

<bundles_post_ra>
// kernel: tpu_custom_call.1
= control target key start
LH: loop header
LB: loop body
LE: loop exit
PB: predicated region body
PF: predicated region fallthrough
CT: control target
= control target key end

     0   :  { %7 = vsyncpa [#allocation6], 0  ;;  %s256_s0 = inlined_call_operand.hbm [shape: f32[16,128], index: 0, kind: input, shape index: {}]   ;;  %s257_s1 = inlined_call_operand.hbm [shape: f32[16,128], index: 1, kind: input, shape index: {}]   ;;  %s258_s2 = inlined_call_operand.hbm [shape: f32[1,1], index: 2, kind: output, shape index: {}]  }
   0x1   :  { %8 = vsyncpa [#allocation9], 0 }
   0x2   :  { %9 = vsyncpa [#allocation7], 0  ;;  %s227_s9 = smov [#allocation5]  }
   0x3   :  { %s15_s10 = sshll.u32 %s227_s9, 4  ;;  %s16_s10 = int_to_ptr.vmem [resolvable:$true] %s15_s10 }
   0x4   :  { %s169_s11 = scalar_lea.vmem %s16_s10, 256  ;;  %p174_p1 = scmp.lt.s32.totalorder %s16_s10, %s16_s10 }
   0x5   :  { %p170_p0 = scmp.ne.s32.totalorder %s16_s10, %s169_s11  ;;  %p175_p2 = scmp.lt.s32.totalorder %s169_s11, %s169_s11 }
   0x7   :  { %p176_p3 = por %p175_p2, %p174_p1 }
   0x9   :  { %p177_p4 = pnand %p176_p3, %p170_p0 }
   0xb   :  { %180 = shalt.err (!%p177_p4)
}
   0xc   :  { %s228_s12 = smov 128   ;;  %s229_s13 = smov 8  }
   0xd   :  { %21 = dma.hbm_to_vmem [thread:$0]  %s256_s0, 256, %s16_s10, [#allocation6], %s228_s12, %s228_s12, %s229_s13  }
   0xe   :  { %s230_s16 = smov [#allocation8]  }
   0xf   :  { %s27_s17 = sshll.u32 %s230_s16, 4  ;;  %s28_s17 = int_to_ptr.vmem [resolvable:$true] %s27_s17 }
  0x10   :  { %s189_s18 = scalar_lea.vmem %s28_s17, 256  ;;  %p194_p6 = scmp.lt.s32.totalorder %s28_s17, %s28_s17 }
  0x11   :  { %p190_p5 = scmp.ne.s32.totalorder %s28_s17, %s189_s18  ;;  %p195_p7 = scmp.lt.s32.totalorder %s189_s18, %s189_s18 }
  0x13   :  { %p196_p8 = por %p195_p7, %p194_p6 }
  0x15   :  { %p197_p9 = pnand %p196_p8, %p190_p5 }
  0x17   :  { %200 = shalt.err (!%p197_p9)
}
  0x18   :  { %33 = dma.hbm_to_vmem [thread:$0]  %s257_s1, 256, %s28_s17, [#allocation9], %s228_s12, %s228_s12, %s229_s13  }
  0x19   :  { %221 = dma.done.wait [#allocation6], 256  }
  0x1a   :  { %222 = vsyncadd [#allocation6], 4294967040 }
  0x1b   :  { %223 = dma.done.wait [#allocation9], 256  }
  0x1c   :  { %224 = vsyncadd [#allocation9], 4294967040  ;;  %v61_v0 = vld [vmem:[#allocation8] sm:$0xff]  ;;  %v62_v1 = vld [vmem:[#allocation8 + $0x8] sm:$0xff]  ;;  %s231_s22 = smov [#allocation10]   ;;  %vm120_vm0 = vcmask 0  }
  0x1d   :  { %v47_v2 = vld [vmem:[#allocation5] sm:$0xff]  ;;  %v74_v3 = vadd.f32 %v62_v1, %v61_v0  ;;  %v48_v4 = vld [vmem:[#allocation5 + $0x8] sm:$0xff]  ;;  %s128_s23 = sshll.u32 %s231_s22, 4  ;;  %s129_s23 = int_to_ptr.vmem [resolvable:$true] %s128_s23 }
  0x1e   :  { %v138_v5 = vmul.f32 -1.442695, %v47_v2  ;;  %v139_v6 = vmul.f32 -1.442695, %v48_v4  ;;  %s201_s24 = scalar_lea.vmem %s129_s23, 16  ;;  %s205_s25 = scalar_lea.vmem %s129_s23, 32 }
  0x1f   :  { %103 = vadd.xlane.f32.xlu1 %v74_v3  ;;  %p202_p10 = scmp.ne.s32.totalorder %s129_s23, %s201_s24  ;;  %p206_p11 = scmp.lt.s32.totalorder %s129_s23, %s129_s23 }
  0x20   :  { %151 = vpow2.f32 %v138_v5  ;;  %p207_p12 = scmp.lt.s32.totalorder %s205_s25, %s201_s24 }
  0x21   :  { %153 = vpow2.f32 %v139_v6 }
  0x22   :  { %p208_p13 = por %p207_p12, %p206_p11 }
  0x24   :  { %p209_p0 = pnand %p208_p13, %p202_p10 }
  0x2d   :  { %v152_v7 = vpop.eup %151 }
  0x2e   :  { %v154_v8 = vpop.eup %153  ;;  %v55_v9 = vadd.f32 1.0, %v152_v7 }
  0x2f   :  { %v56_v10 = vadd.f32 1.0, %v154_v8 }
  0x30   :  { %155 = vrcp.f32 %v55_v9 }
  0x31   :  { %157 = vrcp.f32 %v56_v10 }
  0x3d   :  { %v156_v11 = vpop.eup %155 }
  0x3e   :  { %v158_v12 = vpop.eup %157  ;;  %v64_v13 = vmul.f32 %v156_v11, %v61_v0 }
  0x3f   :  { %v65_v14 = vmul.f32 %v158_v12, %v62_v1  ;;  %v70_v16 = vadd.f32 %v158_v12, %v156_v11 }
  0x41   :  { %v66_v15 = vadd.f32 %v65_v14, %v64_v13 }
  0x43   :  { %81 = vadd.xlane.f32.xlu0 %v66_v15 }
  0x47   :  { %92 = vadd.xlane.f32.xlu0 %v70_v16 }
  0xa8   :  { %v104_v17 = vpop.xlane.xlu1 %103 }
  0xa9   :  { %v105_v18 = vrot.slane %v104_v17, 4 }
  0xab   :  { %v106_v19 = vadd.f32 %v105_v18, %v104_v17 }
  0xad   :  { %v107_v23 = vrot.slane %v106_v19, 2 }
  0xaf   :  { %v108_v29 = vadd.f32 %v107_v23, %v106_v19 }
  0xb1   :  { %v109_v34 = vrot.slane %v108_v29, 1 }
  0xb3   :  { %v110_v37 = vadd.f32 %v109_v34, %v108_v29 }
  0xcc   :  { %v82_v20 = vpop.xlane.xlu0 %81 }
  0xcd   :  { %v83_v21 = vrot.slane %v82_v20, 4 }
  0xcf   :  { %v84_v22 = vadd.f32 %v83_v21, %v82_v20 }
  0xd0   :  { %v93_v24 = vpop.xlane.xlu0 %92 }
  0xd1   :  { %v85_v25 = vrot.slane %v84_v22, 2  ;;  %v94_v26 = vrot.slane %v93_v24, 4 }
  0xd3   :  { %v95_v27 = vadd.f32 %v94_v26, %v93_v24  ;;  %v86_v28 = vadd.f32 %v85_v25, %v84_v22 }
  0xd5   :  { %v96_v30 = vrot.slane %v95_v27, 2  ;;  %v87_v31 = vrot.slane %v86_v28, 1 }
  0xd7   :  { %v97_v32 = vadd.f32 %v96_v30, %v95_v27  ;;  %v88_v33 = vadd.f32 %v87_v31, %v86_v28 }
  0xd9   :  { %140 = vpush %v88_v33  ;;  %v98_v35 = vrot.slane %v97_v32, 1 }
  0xdb   :  { %v99_v36 = vadd.f32 %v98_v35, %v97_v32 }
  0xdd   :  { %142 = vpush %v99_v36 }
  0xde   :  { %144 = vpush %v110_v37 }
 0x10a   :  { %s141_s0 = spop %140 }
 0x10b   :  { %v90_v42 = vstv %s141_s0 }
 0x10c   :  { %v113_v43 = vmul.f32 2.0, %v90_v42 }
 0x10e   :  { %s143_s1 = spop %142  ;;  %v114_v44 = vadd.f32 1.0, %v113_v43 }
 0x10f   :  { %v101_v38 = vstv %s143_s1  ;;  %s145_s21 = spop %144 }
 0x110   :  { %v112_v39 = vstv %s145_s21 }
 0x111   :  { %v115_v40 = vadd.f32 %v112_v39, %v101_v38 }
 0x113   :  { %v116_v41 = vadd.f32 1.0, %v115_v40 }
 0x115   :  { %159 = vrcp.f32 %v116_v41 }
 0x122   :  { %v160_v45 = vpop.eup %159 }
 0x123   :  { %v118_v46 = vmul.f32 %v160_v45, %v114_v44 }
 0x125   :  { %v119_v47 = vsub.f32 1.0, %v118_v46 }
 0x127   :  { %121 = vst.msk [vmem:[#allocation10] sm:$0x1] %vm120_vm0, %v119_v47 }
 0x128   :  { %212 = shalt.err (!%p209_p0)
}
 0x129   :  { %131 = dma.vmem_to_hbm [thread:$0]  %s129_s23, 16, %s258_s2, [#allocation7]  }
 0x12a   :  { %225 = dma.done.wait [#allocation7], 16  }
 0x12b   :  { %226 = vsyncadd [#allocation7], 4294967280 }
 0x12c   :  { %135 = vsyncpa [#allocation6], 1 }
 0x12d   :  { %136 = vsyncpa [#allocation9], 1 }
 0x12e   :  { %137 = vsyncpa [#allocation7], 1 }

</bundles_post_ra>
